<compile_context>
chip_gen: v5e
topology: v5e:2x2
jax: 0.10.0
libtpu: 0.0.40
codegen_flags: <defaults>
</compile_context>

<pallas_src>
import jax
import jax.numpy as jnp
from jax.experimental import pallas as pl
from jax.experimental.pallas import tpu as pltpu

_SUBLANE = 8


def _round_up(n, m):
    return (n + m - 1) // m * m


def mlp_kernel(x_ref, w1_ref, b1_ref, w2_ref, b2_ref, o_ref):
    """One batch tile: out = tanh(x @ W1 + b1) @ W2 + b2 (f32 accumulation)."""
    w1 = w1_ref[...]
    # In-kernel dtype cast (no-op for f32 params; cheap VPU cast for bf16),
    # hidden under the DMA pipeline instead of an extra wrapper HBM pass.
    x = x_ref[...].astype(w1.dtype)

    # Layer 1: MXU matmul with f32 accumulation; bias add + tanh stay f32
    # (v5e has no bf16 VPU/EUP path).
    h = jnp.dot(x, w1, preferred_element_type=jnp.float32) + b1_ref[...]
    h = jnp.tanh(h)

    # Layer 2: downcast only the MXU input to the weight dtype; accumulation
    # and bias add remain f32.
    w2 = w2_ref[...]
    out = jnp.dot(h.astype(w2.dtype), w2,
                  preferred_element_type=jnp.float32) + b2_ref[...]
    o_ref[...] = out.astype(o_ref.dtype)


def prepare_params(w1, b1, w2, b2, param_dtype=jnp.float32):
    """Cast weights to param_dtype (bf16 OK on v5e/v6e/v7x: MXU is bf16-native)
    while keeping biases in f32 (precision) as (1, N) rows for broadcasting."""
    return (w1.astype(param_dtype),
            b1.astype(jnp.float32).reshape(1, -1),
            w2.astype(param_dtype),
            b2.astype(jnp.float32).reshape(1, -1))


def simple_estimator_forward(x, w1, b1, w2, b2, *, tm=4096):
    """Pallas forward pass. x: [batch, num_inputs]; params from prepare_params."""
    batch, num_inputs = x.shape
    num_hidden, num_outputs = w2.shape

    # Batch tile: large (default 4096) to amortize per-grid-step overhead;
    # clamp to the (sublane-rounded) batch for small inputs. VMEM cost
    # ~2*tm*(512B + 64B) stays well under the scoped default on all gens
    # (v7x included), so no vmem_limit_bytes override needed.
    tm = max(_SUBLANE, min(tm, _round_up(batch, _SUBLANE)))
    tm = _round_up(tm, _SUBLANE)

    grid = (pl.cdiv(batch, tm),)  # ragged last tile handled by Pallas masking

    out = pl.pallas_call(
        mlp_kernel,
        out_shape=jax.ShapeDtypeStruct((batch, num_outputs), x.dtype),
        grid=grid,
        in_specs=[
            # x streams per batch tile (native dtype; cast happens in-kernel).
            pl.BlockSpec((tm, num_inputs), lambda i: (i, 0)),
            # Params: constant block index -> VMEM-resident, no re-DMA.
            pl.BlockSpec(w1.shape, lambda i: (0, 0)),
            pl.BlockSpec(b1.shape, lambda i: (0, 0)),
            pl.BlockSpec(w2.shape, lambda i: (0, 0)),
            pl.BlockSpec(b2.shape, lambda i: (0, 0)),
        ],
        # True output width (last block dim == full array dim): 16 B/row of
        # HBM writes instead of a 512 B/row padded slab.
        out_specs=pl.BlockSpec((tm, num_outputs), lambda i: (i, 0)),
        compiler_params=pltpu.CompilerParams(
            # Batch tiles are independent -> shard across TensorCores on v7x.
            # TODO(synk): if profiling shows one idle v7x TC, try CORE_PARALLEL.
            dimension_semantics=("parallel",),
        ),
    )(x, w1, b1, w2, b2)

    return out


def simple_estimator(x, w1, b1, w2, b2, *, tm=4096, min_pallas_batch=256):
    """Dispatch: plain jnp for tiny batches (kernel dispatch overhead dominates),
    Pallas kernel otherwise."""
    if x.shape[0] < min_pallas_batch:
        h = jnp.tanh(x.astype(w1.dtype) @ w1 + b1)
        return (h.astype(w2.dtype) @ w2 + b2).astype(x.dtype)
    return simple_estimator_forward(x, w1, b1, w2, b2, tm=tm)


def init_params(key, num_inputs, num_hidden, num_outputs, dtype=jnp.float32):
    """torch.nn.Linear-style init: U(-1/sqrt(fan_in), +1/sqrt(fan_in)).
    Weights stored as [in_features, out_features]."""
    k1, k2, k3, k4 = jax.random.split(key, 4)
    bound1 = 1.0 / (num_inputs ** 0.5)
    bound2 = 1.0 / (num_hidden ** 0.5)
    w1 = jax.random.uniform(k1, (num_inputs, num_hidden), dtype,
                            minval=-bound1, maxval=bound1)
    b1 = jax.random.uniform(k2, (num_hidden,), dtype,
                            minval=-bound1, maxval=bound1)
    w2 = jax.random.uniform(k3, (num_hidden, num_outputs), dtype,
                            minval=-bound2, maxval=bound2)
    b2 = jax.random.uniform(k4, (num_outputs,), dtype,
                            minval=-bound2, maxval=bound2)
    return w1, b1, w2, b2


if __name__ == "__main__":
    batch = 8
    num_inputs = 16
    num_hidden = 32
    num_outputs = 4

    key = jax.random.PRNGKey(0)
    k_x, k_p = jax.random.split(key)

    x = jax.random.normal(k_x, (batch, num_inputs), dtype=jnp.float32)
    w1, b1, w2, b2 = init_params(k_p, num_inputs, num_hidden, num_outputs)

    ref = jnp.tanh(x @ w1 + b1) @ w2 + b2

    # f32 Pallas path at the module's small shape (strict correctness check).
    p_f32 = prepare_params(w1, b1, w2, b2, param_dtype=jnp.float32)
    out = simple_estimator_forward(x, *p_f32)
    out = jax.block_until_ready(out)
    assert out.shape == (batch, num_outputs)
    assert jnp.allclose(out, ref, atol=1e-5, rtol=1e-5)

    # Dispatcher at tiny batch should take the jnp path and agree too.
    out_disp = jax.block_until_ready(simple_estimator(x, *p_f32))
    assert jnp.allclose(out_disp, ref, atol=1e-5, rtol=1e-5)

    # bf16-weight path at a larger, non-tile-aligned batch to exercise the
    # multi-step ragged grid (x stays f32 in HBM; cast happens in-kernel,
    # biases / accumulation / tanh stay f32).
    big_batch = 1000
    xb = jax.random.normal(k_x, (big_batch, num_inputs), dtype=jnp.float32)
    p_bf16 = prepare_params(w1, b1, w2, b2, param_dtype=jnp.bfloat16)
    out_bf = simple_estimator_forward(xb, *p_bf16, tm=256)  # 4 grid steps, ragged last
    out_bf = jax.block_until_ready(out_bf)
    ref_bf = jnp.tanh(xb @ w1 + b1) @ w2 + b2
    assert out_bf.shape == (big_batch, num_outputs)
    assert jnp.allclose(out_bf, ref_bf, atol=5e-2, rtol=5e-2)

    print("KERNEL_OK")
</pallas_src>

<mosaic_0001>
module attributes {stable_mosaic.version = 11 : i64} {
  func.func @mlp_kernel(%arg0: i32, %arg1: memref<8x16xf32, #tpu.memory_space<vmem>>, %arg2: memref<16x32xf32, #tpu.memory_space<vmem>>, %arg3: memref<1x32xf32, #tpu.memory_space<vmem>>, %arg4: memref<32x4xf32, #tpu.memory_space<vmem>>, %arg5: memref<1x4xf32, #tpu.memory_space<vmem>>, %arg6: memref<8x4xf32, #tpu.memory_space<vmem>>) attributes {dimension_semantics = [#tpu.dimension_semantics<parallel>], iteration_bounds = array<i64: 1>, scalar_prefetch = 0 : i64, scratch_operands = 0 : i64, tpu.core_type = #tpu.core_type<tc>, window_params = [{transform_indices = @transform_0, window_bounds = array<i64: 8, 16>}, {pipeline_mode = #tpu.pipeline_mode<synchronous>, transform_indices = @transform_1, window_bounds = array<i64: 16, 32>}, {pipeline_mode = #tpu.pipeline_mode<synchronous>, transform_indices = @transform_2, window_bounds = array<i64: 1, 32>}, {pipeline_mode = #tpu.pipeline_mode<synchronous>, transform_indices = @transform_3, window_bounds = array<i64: 32, 4>}, {pipeline_mode = #tpu.pipeline_mode<synchronous>, transform_indices = @transform_4, window_bounds = array<i64: 1, 4>}, {transform_indices = @transform_5, window_bounds = array<i64: 8, 4>}]} {
    %c0 = arith.constant 0 : index
    %c0_0 = arith.constant 0 : index
    %0 = vector.load %arg2[%c0, %c0_0] : memref<16x32xf32, #tpu.memory_space<vmem>>, vector<16x32xf32>
    %c0_1 = arith.constant 0 : index
    %c0_2 = arith.constant 0 : index
    %1 = vector.load %arg1[%c0_1, %c0_2] : memref<8x16xf32, #tpu.memory_space<vmem>>, vector<8x16xf32>
    %cst = arith.constant dense<0.000000e+00> : vector<8x32xf32>
    %2 = tpu.matmul %1, %0, %cst {dimension_numbers = #tpu.dot_dimension_numbers<[1], [0], [0], [1], [0, 0, 1, 1], [], []>} : vector<8x16xf32>, vector<16x32xf32>, vector<8x32xf32> -> vector<8x32xf32>
    %c0_3 = arith.constant 0 : index
    %c0_4 = arith.constant 0 : index
    %3 = vector.load %arg3[%c0_3, %c0_4] : memref<1x32xf32, #tpu.memory_space<vmem>>, vector<1x32xf32>
    %4 = vector.broadcast %3 : vector<1x32xf32> to vector<8x32xf32>
    %5 = arith.addf %2, %4 : vector<8x32xf32>
    %6 = math.tanh %5 : vector<8x32xf32>
    %c0_5 = arith.constant 0 : index
    %c0_6 = arith.constant 0 : index
    %7 = vector.load %arg4[%c0_5, %c0_6] : memref<32x4xf32, #tpu.memory_space<vmem>>, vector<32x4xf32>
    %cst_7 = arith.constant dense<0.000000e+00> : vector<8x4xf32>
    %8 = tpu.matmul %6, %7, %cst_7 {dimension_numbers = #tpu.dot_dimension_numbers<[1], [0], [0], [1], [0, 0, 1, 1], [], []>} : vector<8x32xf32>, vector<32x4xf32>, vector<8x4xf32> -> vector<8x4xf32>
    %c0_8 = arith.constant 0 : index
    %c0_9 = arith.constant 0 : index
    %9 = vector.load %arg5[%c0_8, %c0_9] : memref<1x4xf32, #tpu.memory_space<vmem>>, vector<1x4xf32>
    %10 = vector.broadcast %9 : vector<1x4xf32> to vector<8x4xf32>
    %11 = arith.addf %8, %10 : vector<8x4xf32>
    %c0_10 = arith.constant 0 : index
    %c0_11 = arith.constant 0 : index
    %12 = vector.load %arg6[%c0_10, %c0_11] : memref<8x4xf32, #tpu.memory_space<vmem>>, vector<8x4xf32>
    tpu.vector_store %arg6[%c0_10, %c0_11], %11 {strides = array<i32>} : memref<8x4xf32, #tpu.memory_space<vmem>>, vector<8x4xf32>,
    return
  }
  func.func @transform_0(%arg0: i32) -> (i32, i32) {
    %c0_i32 = arith.constant 0 : i32
    %c0_i32_0 = arith.constant 0 : i32
    return %arg0, %c0_i32 : i32, i32
  }
  func.func @transform_1(%arg0: i32) -> (i32, i32) {
    %c0_i32 = arith.constant 0 : i32
    %c0_i32_0 = arith.constant 0 : i32
    %c0_i32_1 = arith.constant 0 : i32
    return %c0_i32, %c0_i32_0 : i32, i32
  }
  func.func @transform_2(%arg0: i32) -> (i32, i32) {
    %c0_i32 = arith.constant 0 : i32
    %c0_i32_0 = arith.constant 0 : i32
    %c0_i32_1 = arith.constant 0 : i32
    return %c0_i32, %c0_i32_0 : i32, i32
  }
  func.func @transform_3(%arg0: i32) -> (i32, i32) {
    %c0_i32 = arith.constant 0 : i32
    %c0_i32_0 = arith.constant 0 : i32
    %c0_i32_1 = arith.constant 0 : i32
    return %c0_i32, %c0_i32_0 : i32, i32
  }
  func.func @transform_4(%arg0: i32) -> (i32, i32) {
    %c0_i32 = arith.constant 0 : i32
    %c0_i32_0 = arith.constant 0 : i32
    %c0_i32_1 = arith.constant 0 : i32
    return %c0_i32, %c0_i32_0 : i32, i32
  }
  func.func @transform_5(%arg0: i32) -> (i32, i32) {
    %c0_i32 = arith.constant 0 : i32
    %c0_i32_0 = arith.constant 0 : i32
    return %arg0, %c0_i32 : i32, i32
  }
}

</mosaic_0001>

<bundles_post_ra>
// kernel: tpu_custom_call.1
= control target key start
LH: loop header
LB: loop body
LE: loop exit
PB: predicated region body
PF: predicated region fallthrough
CT: control target
= control target key end

     0   :  { %vm27_vm0 = vcmask 130048   ;;  %vm60_vm1 = vcmask 261120   ;;  %vm84_vm2 = vcmask 31744   ;;  %s156_s1 = inlined_call_operand.vmem [shape: f32[16,32], index: 1, kind: input, shape index: {}]   ;;  %s157_s0 = inlined_call_operand.vmem [shape: f32[8,16], index: 0, kind: input, shape index: {}]   ;;  %s158_s2 = inlined_call_operand.vmem [shape: f32[1,32], index: 2, kind: input, shape index: {}]   ;;  %s159_s4 = inlined_call_operand.vmem [shape: f32[1,4], index: 4, kind: input, shape index: {}]   ;;  %s160_s3 = inlined_call_operand.vmem [shape: f32[32,4], index: 3, kind: input, shape index: {}]   ;;  %s161_s5 = inlined_call_operand.vmem [shape: f32[8,4], index: 5, kind: output, shape index: {}]  }
   0x1   :  { %v21_v0 = vld [vmem:[%s156_s1 + $0x8] sm:$0xff]  ;;  %v20_v1 = vld [vmem:[%s156_s1] sm:$0xff]  ;;  %v55_v3 = vld [vmem:[%s160_s3 + $0x18] sm:$0xff] }
   0x2   :  { %45 = vmatpush.msra.mxu0 %v21_v0  ;;  %v22_v2 = vld [vmem:[%s157_s0] sm:$0xff]  ;;  %76 = vmatpush.msra.mxu1 %v55_v3  ;;  %v54_v4 = vld [vmem:[%s160_s3 + $0x10] sm:$0xff]  ;;  %v53_v5 = vld [vmem:[%s160_s3 + $0x8] sm:$0xff] }
   0x3   :  { %v52_v6 = vld [vmem:[%s160_s3] sm:$0xff] }
   0x4   :  { %46 = vmatpush.msra.mxu0 %v20_v1  ;;  %77 = vmatpush.msra.mxu1 %v54_v4  ;;  %v92_v7 = vld [vmem:[%s158_s2] ss:$0 sm:$0xff] }
   0x5   :  { %90 = vmatmul.msk.f32.vlgmr.msra.gmra.mxu0 %vm27_vm0, %v22_v2  ;;  %v93_v11 = vld [vmem:[%s159_s4] ss:$0 sm:$0xff] }
   0x6   :  { %78 = vmatpush.msra.mxu1 %v53_v5 }
   0x8   :  { %79 = vmatpush.msra.mxu1 %v52_v6 }
  0x82   :  { %v48_v8 = vpop.f32.mrf.mxu0 }
  0x83   :  { %v49_v9 = vadd.f32 %v92_v7, %v48_v8 }
  0x85   :  { %94 = vtanh.f32 %v49_v9 }
  0x8b   :  { %v95_v10 = vpop.eup %94 }
  0x8c   :  { %91 = vmatmul.msk.f32.vlgmr.msra.gmra.mxu1 %vm60_vm1, %v95_v10 }
 0x109   :  { %v81_v12 = vpop.f32.mrf.mxu1 }
 0x10a   :  { %v82_v13 = vadd.f32 %v93_v11, %v81_v12 }
 0x10c   :  { %85 = vst.msk [vmem:[%s161_s5] sm:$0xff] %vm84_vm2, %v82_v13 }

</bundles_post_ra>
